<compile_context>
chip_gen: v5e
topology: v5e:2x2
jax: 0.10.0
libtpu: 0.0.40
codegen_flags: <defaults>
</compile_context>

<pallas_src>
import jax
import jax.numpy as jnp
from jax.experimental import pallas as pl
from jax.experimental.pallas import tpu as pltpu


def _copy_kernel(x_ref, o_ref):
    # Whole-block copy; lane-dense (width = multiple of 128) so stores are
    # unmasked full-width vst.
    o_ref[...] = x_ref[...]


# Lane-dense slab width: 1024 f32 = 8 vregs wide, multiple of 128 lanes.
_LANE = 1024
# Target ~4 MiB per block: double-buffered (in + out) ~= 16 MiB VMEM,
# comfortably under v7x's 64 MiB physical / 32 MiB default scoped limit.
_TARGET_BLOCK_BYTES = 4 * 1024 * 1024


def base_model_forward(x):
    """Identity forward for the (abstract) BaseModel as a Pallas TPU kernel.

    Accepts any shape/dtype; returns an array equal to x.
    """
    orig_shape = x.shape
    flat = x.reshape(-1)
    total = flat.shape[0]
    itemsize = flat.dtype.itemsize

    # Rows of the lane-dense slab.
    rows = pl.cdiv(total, _LANE)

    # Block row count: ~4 MiB per block, multiple of 8 sublanes.
    row_bytes = _LANE * itemsize
    block_rows = max(8, (_TARGET_BLOCK_BYTES // row_bytes) // 8 * 8)

    if rows <= block_rows:
        # Single block covering the whole slab (block == full array dims, so
        # the (8,128) divisibility constraint does not apply).
        block_rows = rows
        padded_rows = rows
        grid_rows = 1
    else:
        # Round rows up so the grid divides evenly — no ragged tail in-kernel.
        padded_rows = pl.cdiv(rows, block_rows) * block_rows
        grid_rows = padded_rows // block_rows

    padded_total = padded_rows * _LANE
    if padded_total != total:
        flat = jnp.pad(flat, (0, padded_total - total))
    x2d = flat.reshape(padded_rows, _LANE)

    out2d = pl.pallas_call(
        _copy_kernel,
        out_shape=jax.ShapeDtypeStruct((padded_rows, _LANE), x2d.dtype),
        grid_spec=pltpu.PrefetchScalarGridSpec(
            num_scalar_prefetch=0,
            grid=(grid_rows,),
            in_specs=[pl.BlockSpec((block_rows, _LANE), lambda i: (i, 0))],
            out_specs=pl.BlockSpec((block_rows, _LANE), lambda i: (i, 0)),
        ),
        compiler_params=pltpu.CompilerParams(
            # Row axis is independent -> shard across TCs on v7x megacore.
            dimension_semantics=("parallel",),
            # Cover v5e's 16 MiB default scoped VMEM; well under v7x's 64 MiB.
            vmem_limit_bytes=32 * 1024 * 1024,
        ),
    )(x2d)

    out = out2d.reshape(-1)
    if padded_total != total:
        out = out[:total]
    return out.reshape(orig_shape)


if __name__ == "__main__":
    key = jax.random.PRNGKey(0)
    # Small NCHW input consistent with a vision BaseModel subclass:
    # batch=2, channels=4, spatial=16x16.  (2*4*16*16 = 2048 elements is
    # already a multiple of the 1024-wide slab -> no pad / slice ops at all.)
    x = jax.random.normal(key, (2, 4, 16, 16), dtype=jnp.float32)

    y = base_model_forward(x)
    y = jax.block_until_ready(y)

    assert y.shape == x.shape and y.dtype == x.dtype
    assert bool(jnp.allclose(y, x)), "identity forward mismatch"
    print("KERNEL_OK")
</pallas_src>

<mosaic_0001>
module attributes {stable_mosaic.version = 11 : i64} {
  func.func @_copy_kernel(%arg0: i32, %arg1: memref<2x1024xf32, #tpu.memory_space<vmem>>, %arg2: memref<2x1024xf32, #tpu.memory_space<vmem>>) attributes {dimension_semantics = [#tpu.dimension_semantics<parallel>], iteration_bounds = array<i64: 1>, scalar_prefetch = 0 : i64, scratch_operands = 0 : i64, tpu.core_type = #tpu.core_type<tc>, window_params = [{transform_indices = @transform_0, window_bounds = array<i64: 2, 1024>}, {transform_indices = @transform_1, window_bounds = array<i64: 2, 1024>}]} {
    %c0 = arith.constant 0 : index
    %c0_0 = arith.constant 0 : index
    %0 = vector.load %arg1[%c0, %c0_0] : memref<2x1024xf32, #tpu.memory_space<vmem>>, vector<2x1024xf32>
    %c0_1 = arith.constant 0 : index
    %c0_2 = arith.constant 0 : index
    %1 = vector.load %arg2[%c0_1, %c0_2] : memref<2x1024xf32, #tpu.memory_space<vmem>>, vector<2x1024xf32>
    tpu.vector_store %arg2[%c0_1, %c0_2], %0 {strides = array<i32>} : memref<2x1024xf32, #tpu.memory_space<vmem>>, vector<2x1024xf32>,
    return
  }
  func.func @transform_0(%arg0: i32) -> (i32, i32) {
    %c0_i32 = arith.constant 0 : i32
    %c0_i32_0 = arith.constant 0 : i32
    return %arg0, %c0_i32 : i32, i32
  }
  func.func @transform_1(%arg0: i32) -> (i32, i32) {
    %c0_i32 = arith.constant 0 : i32
    %c0_i32_0 = arith.constant 0 : i32
    return %arg0, %c0_i32 : i32, i32
  }
}

</mosaic_0001>

<bundles_post_ra>
// kernel: tpu_custom_call.1
= control target key start
LH: loop header
LB: loop body
LE: loop exit
PB: predicated region body
PF: predicated region fallthrough
CT: control target
= control target key end

     0   :  { %6 = vsyncpa [#allocation3], 0  ;;  %s116_s0 = inlined_call_operand.hbm [shape: f32[2,1024], index: 0, kind: input, shape index: {}]   ;;  %s117_s1 = inlined_call_operand.hbm [shape: f32[2,1024], index: 1, kind: output, shape index: {}]  }
   0x1   :  { %7 = vsyncpa [#allocation4], 0  ;;  %s13_s8 = sshll.u32 %s116_s0, 4  ;;  %s98_s9 = smov [#allocation2]   ;;  %s14_s8 = int_to_ptr.hbm [resolvable:$true] %s13_s8 }
   0x2   :  { %s15_s10 = sshll.u32 %s98_s9, 4  ;;  %s16_s10 = int_to_ptr.vmem [resolvable:$true] %s15_s10 }
   0x3   :  { %18 = dma.hbm_to_vmem [thread:$0]  %s14_s8, 256, %s16_s10, [#allocation3]  }
   0x4   :  { %94 = dma.done.wait [#allocation3], 256  }
   0x5   :  { %95 = vsyncadd [#allocation3], 4294967040  ;;  %s99_s11 = smov [#allocation5]   ;;  %s34_s15 = sshll.u32 %s117_s1, 4  ;;  %v23_v0 = vld [vmem:[#allocation2] sm:$0xff]  ;;  %v24_v1 = vld [vmem:[#allocation2 + $0x8] sm:$0xff]  ;;  %s35_s15 = int_to_ptr.hbm [resolvable:$true] %s34_s15 }
   0x6   :  { %s32_s12 = sshll.u32 %s99_s11, 4  ;;  %25 = vst [vmem:[#allocation5] sm:$0xff] %v23_v0  ;;  %s33_s12 = int_to_ptr.vmem [resolvable:$true] %s32_s12 }
   0x7   :  { %26 = vst [vmem:[#allocation5 + $0x8] sm:$0xff] %v24_v1 }
   0x8   :  { %37 = dma.vmem_to_hbm [thread:$0]  %s33_s12, 256, %s35_s15, [#allocation4]  }
   0x9   :  { %96 = dma.done.wait [#allocation4], 256  }
   0xa   :  { %97 = vsyncadd [#allocation4], 4294967040 }
   0xb   :  { %42 = vsyncpa [#allocation3], 1 }
   0xc   :  { %43 = vsyncpa [#allocation4], 1 }

</bundles_post_ra>
